<compile_context>
chip_gen: v6e
topology: v6e:2x2x1
jax: 0.10.0
libtpu: 0.0.40
codegen_flags: <defaults>
</compile_context>

<pallas_src>
import jax
import jax.numpy as jnp
from jax.experimental import pallas as pl
from jax.experimental.pallas import tpu as pltpu

_LANE = 128
_TARGET_TILE_ROWS = 4096       # (4096, 128) f32 = 2 MiB per tile
_SINGLE_BLOCK_ROWS = 1024      # <= 512 KiB total -> one block, no grid overhead


def _affine_kernel(w_ref, b_ref, x_ref, o_ref):
    # w_ref / b_ref: (1,) f32 scalars in SMEM; x_ref / o_ref: (tile_r, 128) VMEM.
    # Pure VPU fused multiply-add — no MXU round trip for a 1-FLOP/element op.
    o_ref[...] = x_ref[...] * w_ref[0] + b_ref[0]


def _round_up(n, m):
    return ((n + m - 1) // m) * m


def _choose_tile_rows(rows):
    """Pick the row-tile size by bytes, not a fixed row count.

    * whole array <= ~512 KiB: single block (per-step overhead ~0.35 us would
      otherwise dominate this memory-bound elementwise op).
    * larger: ~2 MiB tiles, but at least two grid steps so v7x's two
      TensorCores can each stream half the rows; harmless on v5e/v6e.
    Double-buffered in+out footprint: 4 x 2 MiB = 8 MiB << 32 MiB scoped VMEM.
    """
    if rows <= _SINGLE_BLOCK_ROWS:
        return rows                          # block == full array dims (always legal)
    return min(_TARGET_TILE_ROWS, _round_up(pl.cdiv(rows, 2), 8))


def dummy_model_forward(x, weight, bias):
    """Apply Linear(1, 1): y = x @ weight.T + bias, as a lane-dense VPU map.

    x:      (B, 1) float32
    weight: (1, 1) float32   (torch layout: (out_features, in_features))
    bias:   (1,)   float32
    returns (B, 1) float32
    """
    B = x.shape[0]
    n = B                                    # in/out features == 1 -> B scalars
    rows = pl.cdiv(n, _LANE)
    padded_n = rows * _LANE

    x_flat = x.reshape(-1).astype(jnp.float32)
    if padded_n != n:
        # Unaligned batch: pad by < 128 elements (< 512 B extra HBM traffic).
        # When B % 128 == 0 this branch — and the trailing slice below —
        # disappear and the wrapper is pure zero-copy reshapes.
        x_flat = jnp.pad(x_flat, (0, padded_n - n))
    x2d = x_flat.reshape(rows, _LANE)

    w = weight.reshape(-1).astype(jnp.float32)   # (1,)
    b = bias.reshape(-1).astype(jnp.float32)     # (1,)

    tile_r = _choose_tile_rows(rows)
    # Ragged last block is handled by Pallas: its out-of-bounds stores are
    # masked, so no row padding to a multiple of tile_r is ever streamed.
    grid = (pl.cdiv(rows, tile_r),)

    out2d = pl.pallas_call(
        _affine_kernel,
        out_shape=jax.ShapeDtypeStruct((rows, _LANE), jnp.float32),
        grid=grid,
        in_specs=[
            # Scalar params live in SMEM: no (8,128)-padded VMEM tile and no
            # per-step double-buffered DMA for a single float each.
            pl.BlockSpec(memory_space=pltpu.MemorySpace.SMEM),
            pl.BlockSpec(memory_space=pltpu.MemorySpace.SMEM),
            # Lane-dense, auto-pipelined (double-buffered) input tile.
            pl.BlockSpec((tile_r, _LANE), lambda i: (i, 0)),
        ],
        # Lane-dense output tile -> unmasked full-width vector stores; the
        # ragged final grid block (if any) is masked by Pallas automatically.
        out_specs=pl.BlockSpec((tile_r, _LANE), lambda i: (i, 0)),
        compiler_params=pltpu.CompilerParams(
            dimension_semantics=("parallel",),
        ),
    )(w, b, x2d)

    out_flat = out2d.reshape(-1)
    if padded_n != n:
        out_flat = out_flat[:n]
    return out_flat.reshape(B, 1)


if __name__ == "__main__":
    key = jax.random.PRNGKey(0)
    kw, kb, k1, k2, k3 = jax.random.split(key, 5)

    # Deterministic parameters for Linear(1, 1): weight (1, 1), bias (1,)
    weight = jax.random.normal(kw, (1, 1), dtype=jnp.float32) * 0.5
    bias = jax.random.normal(kb, (1,), dtype=jnp.float32) * 0.1

    def _check(k, batch, atol):
        x = jax.random.normal(k, (batch, 1), dtype=jnp.float32)
        out = jax.block_until_ready(dummy_model_forward(x, weight, bias))
        ref = x @ weight.T + bias
        assert out.shape == (batch, 1)
        assert jnp.allclose(out, ref, atol=atol), f"mismatch vs reference (B={batch})"

    # Small fixture-sized batch (single partial block).
    _check(k1, 8, 1e-6)
    # Aligned batch: zero-copy wrapper path (no pad, no slice), single block.
    _check(k2, 256, 1e-6)
    # Larger batch: multi-tile grid (2 steps, megacore-eligible) with a ragged
    # last block and a <128-element pad.
    _check(k3, 300_000, 1e-5)

    print("KERNEL_OK")
</pallas_src>

<mosaic_0001>
module attributes {stable_mosaic.version = 11 : i64} {
  func.func @_affine_kernel(%arg0: i32, %arg1: memref<1xf32, #tpu.memory_space<smem>>, %arg2: memref<1xf32, #tpu.memory_space<smem>>, %arg3: memref<1x128xf32, #tpu.memory_space<vmem>>, %arg4: memref<1x128xf32, #tpu.memory_space<vmem>>) attributes {dimension_semantics = [#tpu.dimension_semantics<parallel>], iteration_bounds = array<i64: 1>, scalar_prefetch = 0 : i64, scratch_operands = 0 : i64, tpu.core_type = #tpu.core_type<tc>, window_params = [{transform_indices = @transform_0, window_bounds = array<i64: 1>}, {transform_indices = @transform_1, window_bounds = array<i64: 1>}, {transform_indices = @transform_2, window_bounds = array<i64: 1, 128>}, {transform_indices = @transform_3, window_bounds = array<i64: 1, 128>}]} {
    %c0 = arith.constant 0 : index
    %c0_0 = arith.constant 0 : index
    %0 = vector.load %arg3[%c0, %c0_0] : memref<1x128xf32, #tpu.memory_space<vmem>>, vector<1x128xf32>
    %c0_1 = arith.constant 0 : index
    %1 = memref.load %arg1[%c0_1] : memref<1xf32, #tpu.memory_space<smem>>
    %2 = vector.broadcast %1 : f32 to vector<1x128xf32>
    %3 = arith.mulf %0, %2 : vector<1x128xf32>
    %c0_2 = arith.constant 0 : index
    %4 = memref.load %arg2[%c0_2] : memref<1xf32, #tpu.memory_space<smem>>
    %5 = vector.broadcast %4 : f32 to vector<1x128xf32>
    %6 = arith.addf %3, %5 : vector<1x128xf32>
    %c0_3 = arith.constant 0 : index
    %c0_4 = arith.constant 0 : index
    %7 = vector.load %arg4[%c0_3, %c0_4] : memref<1x128xf32, #tpu.memory_space<vmem>>, vector<1x128xf32>
    tpu.vector_store %arg4[%c0_3, %c0_4], %6 {strides = array<i32>} : memref<1x128xf32, #tpu.memory_space<vmem>>, vector<1x128xf32>,
    return
  }
  func.func @transform_0(%arg0: i32) -> i32 {
    %c0_i32 = arith.constant 0 : i32
    %c0_i32_0 = arith.constant 0 : i32
    return %c0_i32 : i32
  }
  func.func @transform_1(%arg0: i32) -> i32 {
    %c0_i32 = arith.constant 0 : i32
    %c0_i32_0 = arith.constant 0 : i32
    return %c0_i32 : i32
  }
  func.func @transform_2(%arg0: i32) -> (i32, i32) {
    %c0_i32 = arith.constant 0 : i32
    %c0_i32_0 = arith.constant 0 : i32
    return %arg0, %c0_i32 : i32, i32
  }
  func.func @transform_3(%arg0: i32) -> (i32, i32) {
    %c0_i32 = arith.constant 0 : i32
    %c0_i32_0 = arith.constant 0 : i32
    return %arg0, %c0_i32 : i32, i32
  }
}

</mosaic_0001>

<bundles_post_ra>
// kernel: tpu_custom_call.1
= control target key start
LH: loop header
LB: loop body
LE: loop exit
PB: predicated region body
PF: predicated region fallthrough
CT: control target
= control target key end

     0   :  { %s95_s0 = inlined_call_operand.<no memory space> [shape: f32[1], index: 0, kind: input, shape index: {}]   ;;  %s96_s1 = inlined_call_operand.<no memory space> [shape: f32[1], index: 1, kind: input, shape index: {}]   ;;  %s97_s2 = inlined_call_operand.vmem [shape: f32[1,128], index: 2, kind: input, shape index: {}]   ;;  %s98_s3 = inlined_call_operand.hbm [shape: f32[1,128], index: 3, kind: output, shape index: {}]  }
   0x1   :  { %v17_v0 = vld [vmem:[%s97_s2] sm:$0x1]  ;;  %v19_v1 = vstv %s95_s0  ;;  %v22_v2 = vstv %s96_s1 }
   0x2   :  { %10 = vsyncpa [#allocation5], 0  ;;  %v20_v3 = vmul.f32 %v19_v1, %v17_v0  ;;  %s62_s18 = smov [#allocation4]  }
   0x3   :  { %s31_s19 = sshll.u32 %s62_s18, 4  ;;  %s32_s19 = int_to_ptr.vmem [resolvable:$true] %s31_s19 }
   0x4   :  { %v23_v4 = vadd.f32 %v22_v2, %v20_v3  ;;  %s40_s20 = scalar_lea.vmem %s32_s19, 16  ;;  %s44_s21 = scalar_lea.vmem %s32_s19, 32 }
   0x5   :  { %p41_p0 = scmp.ne.s32.totalorder %s32_s19, %s40_s20  ;;  %p45_p1 = scmp.lt.s32.totalorder %s32_s19, %s32_s19 }
   0x6   :  { %24 = vst [vmem:[#allocation4] sm:$0x1] %v23_v4  ;;  %p46_p2 = scmp.lt.s32.totalorder %s44_s21, %s40_s20 }
   0x8   :  { %p47_p3 = por %p46_p2, %p45_p1 }
   0xa   :  { %p48_p4 = pnand %p47_p3, %p41_p0 }
   0xc   :  { %51 = shalt.err (!%p48_p4)
}
   0xd   :  { %34 = dma.vmem_to_hbm [thread:$0]  %s32_s19, 16, %s98_s3, [#allocation5]  }
   0xe   :  { %60 = dma.done.wait [#allocation5], 16  }
   0xf   :  { %61 = vsyncadd [#allocation5], 4294967280 }
  0x10   :  { %38 = vsyncpa [#allocation5], 1 }

</bundles_post_ra>
